<compile_context>
chip_gen: v6e
topology: v6e:2x2x1
jax: 0.10.0
libtpu: 0.0.40
codegen_flags: <defaults>
</compile_context>

<pallas_src>
import functools

import jax
import jax.numpy as jnp
from jax.experimental import pallas as pl
from jax.experimental.pallas import tpu as pltpu

EPS = 1e-12

# Lane slots in the per-core partial-sum output row (sublane 0).
LANE_P_NUM = 0   # pitch squared-error sum
LANE_E_NUM = 1   # energy squared-error sum
LANE_F_CNT = 2   # feat_mask count


def _round_up(x, m):
    return (x + m - 1) // m * m


def _pitch_energy_kernel(p_hat_ref, p_ref, e_hat_ref, e_ref, fm_ref, out_ref,
                         *, c_total, tb, nt_per_core):
    """Accumulate masked squared-error sums for pitch/energy over column tiles.

    Inputs are (rows, tb) tiles of a (rows, c_total) slab; the grid is
    (n_cores, nt_per_core) with the trailing axis the reduction axis.
    out_ref is a resident (1, 8, 128) per-core partial-sum block.
    """
    c = pl.program_id(0)            # core / read-stream shard ("parallel")
    t = pl.program_id(1)            # column-tile step ("arbitrary" reduction)

    @pl.when(t == 0)
    def _init():
        out_ref[...] = jnp.zeros_like(out_ref)

    blk = c * nt_per_core + t       # logical column-block index (not clamped)

    def _accumulate(valid):
        p_err = (p_hat_ref[...].astype(jnp.float32)
                 - p_ref[...].astype(jnp.float32)) ** 2
        e_err = (e_hat_ref[...].astype(jnp.float32)
                 - e_ref[...].astype(jnp.float32)) ** 2
        p_num = jnp.sum(jnp.where(valid, p_err, 0.0))
        e_num = jnp.sum(jnp.where(valid, e_err, 0.0))
        f_cnt = jnp.sum(valid.astype(jnp.float32))

        row = jax.lax.broadcasted_iota(jnp.int32, out_ref.shape, 1)
        lane = jax.lax.broadcasted_iota(jnp.int32, out_ref.shape, 2)
        s0 = row == 0
        out_ref[...] += (jnp.where(s0 & (lane == LANE_P_NUM), p_num, 0.0)
                         + jnp.where(s0 & (lane == LANE_E_NUM), e_num, 0.0)
                         + jnp.where(s0 & (lane == LANE_F_CNT), f_cnt, 0.0))

    # Interior (fully in-bounds) blocks: mask straight from feat_mask, no
    # per-element bounds iota/compare.
    interior = (blk + 1) * tb <= c_total

    @pl.when(interior)
    def _interior():
        _accumulate(fm_ref[...] != 0)

    # Boundary block (ragged tail) and padded/clamped blocks of an idle core
    # shard: also mask columns >= c_total (padded blocks become all-invalid).
    @pl.when(jnp.logical_not(interior))
    def _boundary():
        col = blk * tb + jax.lax.broadcasted_iota(jnp.int32, fm_ref.shape, 1)
        _accumulate((fm_ref[...] != 0) & (col < c_total))


def _masked_mse_frame(p_hat, p, e_hat, e, feat_mask, *,
                      lane_tile=16384, n_cores=1,
                      vmem_budget_bytes=8 * 1024 * 1024):
    """Pallas-computed (pitch_loss, energy_loss) for (B, T) frame tensors."""
    B, T = p_hat.shape
    N = B * T

    # Sublane/lane-dense slab: view the contiguous (B, T) data as (8, N//8)
    # whenever that is a free reshape; otherwise keep the (B, T) layout.
    # The loss is a flat masked reduction, so the view does not change it.
    if N % 8 == 0:
        rows, cols = 8, N // 8
    else:
        rows, cols = B, T

    fm = feat_mask.astype(jnp.int8)

    def slab(a):
        return a.reshape(rows, cols)

    p_hat_s, p_s, e_hat_s, e_s, fm_s = map(slab, (p_hat, p, e_hat, e, fm))

    # ---- Column-tile sizing -------------------------------------------------
    # Target: tb a multiple of 128 (or the full width), nb a multiple of
    # n_cores, and the double-buffered (4 data + mask) tile set within budget.
    chunks = pl.cdiv(cols, 128)                 # 128-lane chunks
    tgt_chunks = max(1, lane_tile // 128)
    nb = pl.cdiv(chunks, tgt_chunks)
    nb = n_cores * pl.cdiv(nb, n_cores)         # even split across cores
    tb = 128 * pl.cdiv(chunks, nb)

    def _padded_rows(itemsize):
        sub = max(1, 32 // itemsize)            # sublane tile: 8/16/32
        return _round_up(rows, sub)

    bytes_per_col = sum(_padded_rows(a.dtype.itemsize) * a.dtype.itemsize
                        for a in (p_hat_s, p_s, e_hat_s, e_s))
    bytes_per_col += _padded_rows(1)            # int8 mask
    max_tb = max(128, (vmem_budget_bytes // (2 * bytes_per_col)) // 128 * 128)
    tb = min(tb, max_tb)
    tb = min(tb, cols)                          # full width is always legal

    nb_real = pl.cdiv(cols, tb)                 # real (non-empty) blocks
    nb_sched = n_cores * pl.cdiv(nb_real, n_cores)
    nt = nb_sched // n_cores                    # steps per core shard

    # Clamp the DMA block index into range; fully out-of-range logical blocks
    # are zeroed in-kernel by the col < cols mask.
    frame_map = lambda c, t: (0, jnp.minimum(c * nt + t, nb_real - 1))

    kernel = functools.partial(_pitch_energy_kernel,
                               c_total=cols, tb=tb, nt_per_core=nt)

    args = (p_hat_s, p_s, e_hat_s, e_s, fm_s)
    bytes_accessed = int(sum(a.size * a.dtype.itemsize for a in args)
                         + n_cores * 8 * 128 * 4)

    partials = pl.pallas_call(
        kernel,
        out_shape=jax.ShapeDtypeStruct((n_cores, 8, 128), jnp.float32),
        grid=(n_cores, nt),
        in_specs=[
            pl.BlockSpec((rows, tb), frame_map),   # p_hat
            pl.BlockSpec((rows, tb), frame_map),   # p
            pl.BlockSpec((rows, tb), frame_map),   # e_hat
            pl.BlockSpec((rows, tb), frame_map),   # e
            pl.BlockSpec((rows, tb), frame_map),   # feat_mask (int8)
        ],
        out_specs=pl.BlockSpec((1, 8, 128), lambda c, t: (c, 0, 0)),
        compiler_params=pltpu.CompilerParams(
            dimension_semantics=("parallel", "arbitrary")),
        cost_estimate=pl.CostEstimate(
            flops=int(12 * N), transcendentals=0,
            bytes_accessed=bytes_accessed),
    )(*args)

    # Combine per-core partials; the two divisions happen once, outside the
    # hot loop (tiny scalar XLA ops).
    sums = jnp.sum(partials, axis=0)[0]            # (128,) f32
    denom = sums[LANE_F_CNT]
    return sums[LANE_P_NUM] / denom, sums[LANE_E_NUM] / denom


def variance_loss(d_hat, d, p_hat, p, e_hat, e, token_mask, feat_mask, *,
                  eps=EPS, lane_tile=16384, n_cores=1):
    """Returns (duration_loss, pitch_loss, energy_loss) as float32 scalars.

    Matches torch masked_fill(~mask, 0).sum() / mask.sum() semantics for
    arbitrary boolean masks.  (Like the reference, an all-zero mask yields
    NaN/Inf — not guarded here.)  Use n_cores=2 on v7x (two TensorCores).
    """
    assert d_hat.shape == d.shape
    assert p_hat.shape == p.shape
    assert e_hat.shape == e.shape

    # Duration loss: tiny (B, S) one-shot computation (holds the only log),
    # cheaper as plain fused XLA than as extra kernel inputs.
    tmask = token_mask.astype(bool)
    log_d = jnp.log(d.astype(jnp.float32) + eps)      # eps added after f32 upcast
    d_err = (d_hat.astype(jnp.float32) - log_d) ** 2
    duration_loss = (jnp.sum(jnp.where(tmask, d_err, 0.0))
                     / jnp.sum(tmask.astype(jnp.float32)))

    pitch_loss, energy_loss = _masked_mse_frame(
        p_hat, p, e_hat, e, feat_mask.astype(bool),
        lane_tile=lane_tile, n_cores=n_cores)
    return duration_loss, pitch_loss, energy_loss


def _reference(d_hat, d, p_hat, p, e_hat, e, token_mask, feat_mask):
    tm = token_mask.astype(bool)
    fm = feat_mask.astype(bool)
    log_d = jnp.log(d.astype(jnp.float32) + EPS)
    dl = (jnp.sum(jnp.where(tm, (d_hat.astype(jnp.float32) - log_d) ** 2, 0.0))
          / jnp.sum(tm.astype(jnp.float32)))
    fden = jnp.sum(fm.astype(jnp.float32))
    pl_ = jnp.sum(jnp.where(fm, (p_hat.astype(jnp.float32)
                                 - p.astype(jnp.float32)) ** 2, 0.0)) / fden
    el = jnp.sum(jnp.where(fm, (e_hat.astype(jnp.float32)
                                - e.astype(jnp.float32)) ** 2, 0.0)) / fden
    return dl, pl_, el


def _check(out, ref, rtol, atol):
    for got, want in zip(out, ref):
        assert jnp.allclose(got, want, rtol=rtol, atol=atol), (got, want)


if __name__ == "__main__":
    key = jax.random.PRNGKey(0)

    # --- Test 1: small shapes consistent with the module (f32, length masks).
    B, S, T = 2, 8, 16
    ks = jax.random.split(key, 6)
    d_hat = jax.random.normal(ks[0], (B, S), jnp.float32)
    d = jax.random.uniform(ks[1], (B, S), jnp.float32, 0.5, 10.0)   # positive durations
    p_hat = jax.random.normal(ks[2], (B, T), jnp.float32)
    p = jax.random.normal(ks[3], (B, T), jnp.float32)
    e_hat = jax.random.normal(ks[4], (B, T), jnp.float32)
    e = jax.random.normal(ks[5], (B, T), jnp.float32)
    tok_lens = jnp.array([S, S - 3], dtype=jnp.int32)
    feat_lens = jnp.array([T, T - 5], dtype=jnp.int32)
    token_mask = jnp.arange(S)[None, :] < tok_lens[:, None]
    feat_mask = jnp.arange(T)[None, :] < feat_lens[:, None]

    out = variance_loss(d_hat, d, p_hat, p, e_hat, e, token_mask, feat_mask)
    out = jax.block_until_ready(out)
    ref = _reference(d_hat, d, p_hat, p, e_hat, e, token_mask, feat_mask)
    _check(out, ref, rtol=1e-5, atol=1e-6)

    # --- Test 2: bf16 inputs, (B, T) fallback layout (B*T % 8 != 0), ragged
    #             multi-block tiling, arbitrary boolean masks.
    B2, S2, T2 = 3, 7, 1111
    ks2 = jax.random.split(jax.random.PRNGKey(1), 8)
    d_hat2 = jax.random.normal(ks2[0], (B2, S2), jnp.bfloat16)
    d2 = jax.random.uniform(ks2[1], (B2, S2), jnp.bfloat16, 0.5, 10.0)
    p_hat2 = jax.random.normal(ks2[2], (B2, T2), jnp.bfloat16)
    p2 = jax.random.normal(ks2[3], (B2, T2), jnp.bfloat16)
    e_hat2 = jax.random.normal(ks2[4], (B2, T2), jnp.bfloat16)
    e2 = jax.random.normal(ks2[5], (B2, T2), jnp.bfloat16)
    token_mask2 = jax.random.bernoulli(ks2[6], 0.7, (B2, S2))
    feat_mask2 = jax.random.bernoulli(ks2[7], 0.8, (B2, T2))

    out2 = variance_loss(d_hat2, d2, p_hat2, p2, e_hat2, e2,
                         token_mask2, feat_mask2, lane_tile=512)
    out2 = jax.block_until_ready(out2)
    ref2 = _reference(d_hat2, d2, p_hat2, p2, e_hat2, e2,
                      token_mask2, feat_mask2)
    _check(out2, ref2, rtol=1e-4, atol=1e-5)

    # --- Test 3: dense (8, N/8) slab layout, two-core grid with a padded
    #             (clamped) block, f32, arbitrary masks.
    B3, S3, T3 = 4, 40, 2500
    ks3 = jax.random.split(jax.random.PRNGKey(2), 8)
    d_hat3 = jax.random.normal(ks3[0], (B3, S3), jnp.float32)
    d3 = jax.random.uniform(ks3[1], (B3, S3), jnp.float32, 0.5, 10.0)
    p_hat3 = jax.random.normal(ks3[2], (B3, T3), jnp.float32)
    p3 = jax.random.normal(ks3[3], (B3, T3), jnp.float32)
    e_hat3 = jax.random.normal(ks3[4], (B3, T3), jnp.float32)
    e3 = jax.random.normal(ks3[5], (B3, T3), jnp.float32)
    token_mask3 = jax.random.bernoulli(ks3[6], 0.6, (B3, S3))
    feat_mask3 = jax.random.bernoulli(ks3[7], 0.75, (B3, T3))

    out3 = variance_loss(d_hat3, d3, p_hat3, p3, e_hat3, e3,
                         token_mask3, feat_mask3, lane_tile=256, n_cores=2)
    out3 = jax.block_until_ready(out3)
    ref3 = _reference(d_hat3, d3, p_hat3, p3, e_hat3, e3,
                      token_mask3, feat_mask3)
    _check(out3, ref3, rtol=1e-5, atol=1e-6)

    print("KERNEL_OK")
</pallas_src>

<mosaic_0001>
module attributes {stable_mosaic.version = 11 : i64} {
  func.func @_pitch_energy_kernel(%arg0: i32, %arg1: i32, %arg2: memref<8x4xf32, #tpu.memory_space<vmem>>, %arg3: memref<8x4xf32, #tpu.memory_space<vmem>>, %arg4: memref<8x4xf32, #tpu.memory_space<vmem>>, %arg5: memref<8x4xf32, #tpu.memory_space<vmem>>, %arg6: memref<8x4xi8, #tpu.memory_space<vmem>>, %arg7: memref<1x8x128xf32, #tpu.memory_space<vmem>>) attributes {dimension_semantics = [#tpu.dimension_semantics<parallel>, #tpu.dimension_semantics<arbitrary>], iteration_bounds = array<i64: 1, 1>, scalar_prefetch = 0 : i64, scratch_operands = 0 : i64, tpu.core_type = #tpu.core_type<tc>, window_params = [{transform_indices = @transform_0, window_bounds = array<i64: 8, 4>}, {transform_indices = @transform_1, window_bounds = array<i64: 8, 4>}, {transform_indices = @transform_2, window_bounds = array<i64: 8, 4>}, {transform_indices = @transform_3, window_bounds = array<i64: 8, 4>}, {transform_indices = @transform_4, window_bounds = array<i64: 8, 4>}, {transform_indices = @transform_5, window_bounds = array<i64: 1, 8, 128>}]} {
    %c0_i32 = arith.constant 0 : i32
    %0 = arith.cmpi eq, %arg1, %c0_i32 : i32
    %1 = arith.extui %0 : i1 to i32
    %c0_i32_0 = arith.constant 0 : i32
    %2 = arith.cmpi ne, %1, %c0_i32_0 : i32
    scf.if %2 {
      %cst = arith.constant 0.000000e+00 : f32
      %13 = vector.broadcast %cst : f32 to vector<1x8x128xf32>
      %c0 = arith.constant 0 : index
      %c0_5 = arith.constant 0 : index
      %c0_6 = arith.constant 0 : index
      %14 = vector.load %arg7[%c0, %c0_5, %c0_6] : memref<1x8x128xf32, #tpu.memory_space<vmem>>, vector<1x8x128xf32>
      tpu.vector_store %arg7[%c0, %c0_5, %c0_6], %13 {strides = array<i32>} : memref<1x8x128xf32, #tpu.memory_space<vmem>>, vector<1x8x128xf32>,
    } else {
    }
    %c1_i32 = arith.constant 1 : i32
    %3 = arith.muli %arg0, %c1_i32 : i32
    %4 = arith.addi %3, %arg1 : i32
    %c1_i32_1 = arith.constant 1 : i32
    %5 = arith.addi %4, %c1_i32_1 : i32
    %c4_i32 = arith.constant 4 : i32
    %6 = arith.muli %5, %c4_i32 : i32
    %c4_i32_2 = arith.constant 4 : i32
    %7 = arith.cmpi sle, %6, %c4_i32_2 : i32
    %8 = arith.extui %7 : i1 to i32
    %c0_i32_3 = arith.constant 0 : i32
    %9 = arith.cmpi ne, %8, %c0_i32_3 : i32
    scf.if %9 {
      %c0 = arith.constant 0 : index
      %c0_5 = arith.constant 0 : index
      %13 = vector.load %arg6[%c0, %c0_5] : memref<8x4xi8, #tpu.memory_space<vmem>>, vector<8x4xi8>
      %c0_i8 = arith.constant 0 : i8
      %14 = vector.broadcast %c0_i8 : i8 to vector<8x4xi8>
      %15 = arith.cmpi ne, %13, %14 : vector<8x4xi8>
      %c0_6 = arith.constant 0 : index
      %c0_7 = arith.constant 0 : index
      %16 = vector.load %arg2[%c0_6, %c0_7] : memref<8x4xf32, #tpu.memory_space<vmem>>, vector<8x4xf32>
      %c0_8 = arith.constant 0 : index
      %c0_9 = arith.constant 0 : index
      %17 = vector.load %arg3[%c0_8, %c0_9] : memref<8x4xf32, #tpu.memory_space<vmem>>, vector<8x4xf32>
      %18 = arith.subf %16, %17 : vector<8x4xf32>
      %19 = arith.mulf %18, %18 : vector<8x4xf32>
      %c0_10 = arith.constant 0 : index
      %c0_11 = arith.constant 0 : index
      %20 = vector.load %arg4[%c0_10, %c0_11] : memref<8x4xf32, #tpu.memory_space<vmem>>, vector<8x4xf32>
      %c0_12 = arith.constant 0 : index
      %c0_13 = arith.constant 0 : index
      %21 = vector.load %arg5[%c0_12, %c0_13] : memref<8x4xf32, #tpu.memory_space<vmem>>, vector<8x4xf32>
      %22 = arith.subf %20, %21 : vector<8x4xf32>
      %23 = arith.mulf %22, %22 : vector<8x4xf32>
      %cst = arith.constant 0.000000e+00 : f32
      %24 = vector.broadcast %cst : f32 to vector<8x4xf32>
      %25 = arith.select %15, %19, %24 : vector<8x4xi1>, vector<8x4xf32>
      %26 = vector.shape_cast %25 : vector<8x4xf32> to vector<1x8x4xf32>
      %cst_14 = arith.constant dense<0.000000e+00> : vector<1xf32>
      %27 = vector.multi_reduction <add>, %26, %cst_14 [1, 2] : vector<1x8x4xf32> to vector<1xf32>
      %28 = vector.shape_cast %27 : vector<1xf32> to vector<1x1x1xf32>
      %29 = vector.extract %28[0, 0, 0] : f32 from vector<1x1x1xf32>
      %cst_15 = arith.constant 0.000000e+00 : f32
      %30 = vector.broadcast %cst_15 : f32 to vector<8x4xf32>
      %31 = arith.select %15, %23, %30 : vector<8x4xi1>, vector<8x4xf32>
      %32 = vector.shape_cast %31 : vector<8x4xf32> to vector<1x8x4xf32>
      %cst_16 = arith.constant dense<0.000000e+00> : vector<1xf32>
      %33 = vector.multi_reduction <add>, %32, %cst_16 [1, 2] : vector<1x8x4xf32> to vector<1xf32>
      %34 = vector.shape_cast %33 : vector<1xf32> to vector<1x1x1xf32>
      %35 = vector.extract %34[0, 0, 0] : f32 from vector<1x1x1xf32>
      %36 = arith.extui %15 : vector<8x4xi1> to vector<8x4xi32>
      %37 = arith.sitofp %36 : vector<8x4xi32> to vector<8x4xf32>
      %38 = vector.shape_cast %37 : vector<8x4xf32> to vector<1x8x4xf32>
      %cst_17 = arith.constant dense<0.000000e+00> : vector<1xf32>
      %39 = vector.multi_reduction <add>, %38, %cst_17 [1, 2] : vector<1x8x4xf32> to vector<1xf32>
      %40 = vector.shape_cast %39 : vector<1xf32> to vector<1x1x1xf32>
      %41 = vector.extract %40[0, 0, 0] : f32 from vector<1x1x1xf32>
      %42 = tpu.iota {dimensions = array<i32: 1>} : vector<1x8x128xi32>
      %43 = tpu.iota {dimensions = array<i32: 2>} : vector<1x8x128xi32>
      %c0_i32_18 = arith.constant 0 : i32
      %44 = vector.broadcast %c0_i32_18 : i32 to vector<1x8x128xi32>
      %45 = arith.cmpi eq, %42, %44 : vector<1x8x128xi32>
      %c0_19 = arith.constant 0 : index
      %c0_20 = arith.constant 0 : index
      %c0_21 = arith.constant 0 : index
      %46 = vector.load %arg7[%c0_19, %c0_20, %c0_21] : memref<1x8x128xf32, #tpu.memory_space<vmem>>, vector<1x8x128xf32>
      %c0_i32_22 = arith.constant 0 : i32
      %47 = vector.broadcast %c0_i32_22 : i32 to vector<1x8x128xi32>
      %48 = arith.cmpi eq, %43, %47 : vector<1x8x128xi32>
      %49 = arith.andi %45, %48 : vector<1x8x128xi1>
      %cst_23 = arith.constant 0.000000e+00 : f32
      %50 = vector.broadcast %29 : f32 to vector<1x8x128xf32>
      %51 = vector.broadcast %cst_23 : f32 to vector<1x8x128xf32>
      %52 = arith.select %49, %50, %51 : vector<1x8x128xi1>, vector<1x8x128xf32>
      %c1_i32_24 = arith.constant 1 : i32
      %53 = vector.broadcast %c1_i32_24 : i32 to vector<1x8x128xi32>
      %54 = arith.cmpi eq, %43, %53 : vector<1x8x128xi32>
      %55 = arith.andi %45, %54 : vector<1x8x128xi1>
      %cst_25 = arith.constant 0.000000e+00 : f32
      %56 = vector.broadcast %35 : f32 to vector<1x8x128xf32>
      %57 = vector.broadcast %cst_25 : f32 to vector<1x8x128xf32>
      %58 = arith.select %55, %56, %57 : vector<1x8x128xi1>, vector<1x8x128xf32>
      %59 = arith.addf %52, %58 : vector<1x8x128xf32>
      %c2_i32 = arith.constant 2 : i32
      %60 = vector.broadcast %c2_i32 : i32 to vector<1x8x128xi32>
      %61 = arith.cmpi eq, %43, %60 : vector<1x8x128xi32>
      %62 = arith.andi %45, %61 : vector<1x8x128xi1>
      %cst_26 = arith.constant 0.000000e+00 : f32
      %63 = vector.broadcast %41 : f32 to vector<1x8x128xf32>
      %64 = vector.broadcast %cst_26 : f32 to vector<1x8x128xf32>
      %65 = arith.select %62, %63, %64 : vector<1x8x128xi1>, vector<1x8x128xf32>
      %66 = arith.addf %59, %65 : vector<1x8x128xf32>
      %67 = arith.addf %46, %66 : vector<1x8x128xf32>
      %c0_27 = arith.constant 0 : index
      %c0_28 = arith.constant 0 : index
      %c0_29 = arith.constant 0 : index
      %68 = vector.load %arg7[%c0_27, %c0_28, %c0_29] : memref<1x8x128xf32, #tpu.memory_space<vmem>>, vector<1x8x128xf32>
      tpu.vector_store %arg7[%c0_27, %c0_28, %c0_29], %67 {strides = array<i32>} : memref<1x8x128xf32, #tpu.memory_space<vmem>>, vector<1x8x128xf32>,
    } else {
    }
    %true = arith.constant true
    %10 = arith.xori %7, %true : i1
    %11 = arith.extui %10 : i1 to i32
    %c0_i32_4 = arith.constant 0 : i32
    %12 = arith.cmpi ne, %11, %c0_i32_4 : i32
    scf.if %12 {
      %c4_i32_5 = arith.constant 4 : i32
      %13 = arith.muli %4, %c4_i32_5 : i32
      %14 = tpu.iota {dimensions = array<i32: 1>} : vector<8x4xi32>
      %15 = vector.broadcast %13 : i32 to vector<8x4xi32>
      %16 = arith.addi %15, %14 : vector<8x4xi32>
      %c0 = arith.constant 0 : index
      %c0_6 = arith.constant 0 : index
      %17 = vector.load %arg6[%c0, %c0_6] : memref<8x4xi8, #tpu.memory_space<vmem>>, vector<8x4xi8>
      %c0_i8 = arith.constant 0 : i8
      %18 = vector.broadcast %c0_i8 : i8 to vector<8x4xi8>
      %19 = arith.cmpi ne, %17, %18 : vector<8x4xi8>
      %c4_i32_7 = arith.constant 4 : i32
      %20 = vector.broadcast %c4_i32_7 : i32 to vector<8x4xi32>
      %21 = arith.cmpi slt, %16, %20 : vector<8x4xi32>
      %22 = arith.andi %19, %21 : vector<8x4xi1>
      %c0_8 = arith.constant 0 : index
      %c0_9 = arith.constant 0 : index
      %23 = vector.load %arg2[%c0_8, %c0_9] : memref<8x4xf32, #tpu.memory_space<vmem>>, vector<8x4xf32>
      %c0_10 = arith.constant 0 : index
      %c0_11 = arith.constant 0 : index
      %24 = vector.load %arg3[%c0_10, %c0_11] : memref<8x4xf32, #tpu.memory_space<vmem>>, vector<8x4xf32>
      %25 = arith.subf %23, %24 : vector<8x4xf32>
      %26 = arith.mulf %25, %25 : vector<8x4xf32>
      %c0_12 = arith.constant 0 : index
      %c0_13 = arith.constant 0 : index
      %27 = vector.load %arg4[%c0_12, %c0_13] : memref<8x4xf32, #tpu.memory_space<vmem>>, vector<8x4xf32>
      %c0_14 = arith.constant 0 : index
      %c0_15 = arith.constant 0 : index
      %28 = vector.load %arg5[%c0_14, %c0_15] : memref<8x4xf32, #tpu.memory_space<vmem>>, vector<8x4xf32>
      %29 = arith.subf %27, %28 : vector<8x4xf32>
      %30 = arith.mulf %29, %29 : vector<8x4xf32>
      %cst = arith.constant 0.000000e+00 : f32
      %31 = vector.broadcast %cst : f32 to vector<8x4xf32>
      %32 = arith.select %22, %26, %31 : vector<8x4xi1>, vector<8x4xf32>
      %33 = vector.shape_cast %32 : vector<8x4xf32> to vector<1x8x4xf32>
      %cst_16 = arith.constant dense<0.000000e+00> : vector<1xf32>
      %34 = vector.multi_reduction <add>, %33, %cst_16 [1, 2] : vector<1x8x4xf32> to vector<1xf32>
      %35 = vector.shape_cast %34 : vector<1xf32> to vector<1x1x1xf32>
      %36 = vector.extract %35[0, 0, 0] : f32 from vector<1x1x1xf32>
      %cst_17 = arith.constant 0.000000e+00 : f32
      %37 = vector.broadcast %cst_17 : f32 to vector<8x4xf32>
      %38 = arith.select %22, %30, %37 : vector<8x4xi1>, vector<8x4xf32>
      %39 = vector.shape_cast %38 : vector<8x4xf32> to vector<1x8x4xf32>
      %cst_18 = arith.constant dense<0.000000e+00> : vector<1xf32>
      %40 = vector.multi_reduction <add>, %39, %cst_18 [1, 2] : vector<1x8x4xf32> to vector<1xf32>
      %41 = vector.shape_cast %40 : vector<1xf32> to vector<1x1x1xf32>
      %42 = vector.extract %41[0, 0, 0] : f32 from vector<1x1x1xf32>
      %43 = arith.extui %22 : vector<8x4xi1> to vector<8x4xi32>
      %44 = arith.sitofp %43 : vector<8x4xi32> to vector<8x4xf32>
      %45 = vector.shape_cast %44 : vector<8x4xf32> to vector<1x8x4xf32>
      %cst_19 = arith.constant dense<0.000000e+00> : vector<1xf32>
      %46 = vector.multi_reduction <add>, %45, %cst_19 [1, 2] : vector<1x8x4xf32> to vector<1xf32>
      %47 = vector.shape_cast %46 : vector<1xf32> to vector<1x1x1xf32>
      %48 = vector.extract %47[0, 0, 0] : f32 from vector<1x1x1xf32>
      %49 = tpu.iota {dimensions = array<i32: 1>} : vector<1x8x128xi32>
      %50 = tpu.iota {dimensions = array<i32: 2>} : vector<1x8x128xi32>
      %c0_i32_20 = arith.constant 0 : i32
      %51 = vector.broadcast %c0_i32_20 : i32 to vector<1x8x128xi32>
      %52 = arith.cmpi eq, %49, %51 : vector<1x8x128xi32>
      %c0_21 = arith.constant 0 : index
      %c0_22 = arith.constant 0 : index
      %c0_23 = arith.constant 0 : index
      %53 = vector.load %arg7[%c0_21, %c0_22, %c0_23] : memref<1x8x128xf32, #tpu.memory_space<vmem>>, vector<1x8x128xf32>
      %c0_i32_24 = arith.constant 0 : i32
      %54 = vector.broadcast %c0_i32_24 : i32 to vector<1x8x128xi32>
      %55 = arith.cmpi eq, %50, %54 : vector<1x8x128xi32>
      %56 = arith.andi %52, %55 : vector<1x8x128xi1>
      %cst_25 = arith.constant 0.000000e+00 : f32
      %57 = vector.broadcast %36 : f32 to vector<1x8x128xf32>
      %58 = vector.broadcast %cst_25 : f32 to vector<1x8x128xf32>
      %59 = arith.select %56, %57, %58 : vector<1x8x128xi1>, vector<1x8x128xf32>
      %c1_i32_26 = arith.constant 1 : i32
      %60 = vector.broadcast %c1_i32_26 : i32 to vector<1x8x128xi32>
      %61 = arith.cmpi eq, %50, %60 : vector<1x8x128xi32>
      %62 = arith.andi %52, %61 : vector<1x8x128xi1>
      %cst_27 = arith.constant 0.000000e+00 : f32
      %63 = vector.broadcast %42 : f32 to vector<1x8x128xf32>
      %64 = vector.broadcast %cst_27 : f32 to vector<1x8x128xf32>
      %65 = arith.select %62, %63, %64 : vector<1x8x128xi1>, vector<1x8x128xf32>
      %66 = arith.addf %59, %65 : vector<1x8x128xf32>
      %c2_i32 = arith.constant 2 : i32
      %67 = vector.broadcast %c2_i32 : i32 to vector<1x8x128xi32>
      %68 = arith.cmpi eq, %50, %67 : vector<1x8x128xi32>
      %69 = arith.andi %52, %68 : vector<1x8x128xi1>
      %cst_28 = arith.constant 0.000000e+00 : f32
      %70 = vector.broadcast %48 : f32 to vector<1x8x128xf32>
      %71 = vector.broadcast %cst_28 : f32 to vector<1x8x128xf32>
      %72 = arith.select %69, %70, %71 : vector<1x8x128xi1>, vector<1x8x128xf32>
      %73 = arith.addf %66, %72 : vector<1x8x128xf32>
      %74 = arith.addf %53, %73 : vector<1x8x128xf32>
      %c0_29 = arith.constant 0 : index
      %c0_30 = arith.constant 0 : index
      %c0_31 = arith.constant 0 : index
      %75 = vector.load %arg7[%c0_29, %c0_30, %c0_31] : memref<1x8x128xf32, #tpu.memory_space<vmem>>, vector<1x8x128xf32>
      tpu.vector_store %arg7[%c0_29, %c0_30, %c0_31], %74 {strides = array<i32>} : memref<1x8x128xf32, #tpu.memory_space<vmem>>, vector<1x8x128xf32>,
    } else {
    }
    return
  }
  func.func @transform_0(%arg0: i32, %arg1: i32) -> (i32, i32) {
    %c1_i32 = arith.constant 1 : i32
    %0 = arith.muli %arg0, %c1_i32 : i32
    %1 = arith.addi %0, %arg1 : i32
    %c0_i32 = arith.constant 0 : i32
    %2 = arith.minsi %1, %c0_i32 : i32
    %c0_i32_0 = arith.constant 0 : i32
    %c0_i32_1 = arith.constant 0 : i32
    return %c0_i32_0, %2 : i32, i32
  }
  func.func @transform_1(%arg0: i32, %arg1: i32) -> (i32, i32) {
    %c1_i32 = arith.constant 1 : i32
    %0 = arith.muli %arg0, %c1_i32 : i32
    %1 = arith.addi %0, %arg1 : i32
    %c0_i32 = arith.constant 0 : i32
    %2 = arith.minsi %1, %c0_i32 : i32
    %c0_i32_0 = arith.constant 0 : i32
    %c0_i32_1 = arith.constant 0 : i32
    return %c0_i32_0, %2 : i32, i32
  }
  func.func @transform_2(%arg0: i32, %arg1: i32) -> (i32, i32) {
    %c1_i32 = arith.constant 1 : i32
    %0 = arith.muli %arg0, %c1_i32 : i32
    %1 = arith.addi %0, %arg1 : i32
    %c0_i32 = arith.constant 0 : i32
    %2 = arith.minsi %1, %c0_i32 : i32
    %c0_i32_0 = arith.constant 0 : i32
    %c0_i32_1 = arith.constant 0 : i32
    return %c0_i32_0, %2 : i32, i32
  }
  func.func @transform_3(%arg0: i32, %arg1: i32) -> (i32, i32) {
    %c1_i32 = arith.constant 1 : i32
    %0 = arith.muli %arg0, %c1_i32 : i32
    %1 = arith.addi %0, %arg1 : i32
    %c0_i32 = arith.constant 0 : i32
    %2 = arith.minsi %1, %c0_i32 : i32
    %c0_i32_0 = arith.constant 0 : i32
    %c0_i32_1 = arith.constant 0 : i32
    return %c0_i32_0, %2 : i32, i32
  }
  func.func @transform_4(%arg0: i32, %arg1: i32) -> (i32, i32) {
    %c1_i32 = arith.constant 1 : i32
    %0 = arith.muli %arg0, %c1_i32 : i32
    %1 = arith.addi %0, %arg1 : i32
    %c0_i32 = arith.constant 0 : i32
    %2 = arith.minsi %1, %c0_i32 : i32
    %c0_i32_0 = arith.constant 0 : i32
    %c0_i32_1 = arith.constant 0 : i32
    return %c0_i32_0, %2 : i32, i32
  }
  func.func @transform_5(%arg0: i32, %arg1: i32) -> (i32, i32, i32) {
    %c0_i32 = arith.constant 0 : i32
    %c0_i32_0 = arith.constant 0 : i32
    %c0_i32_1 = arith.constant 0 : i32
    return %arg0, %c0_i32, %c0_i32_0 : i32, i32, i32
  }
}

</mosaic_0001>

<bundles_post_ra>
// kernel: tpu_custom_call.1
= control target key start
LH: loop header
LB: loop body
LE: loop exit
PB: predicated region body
PF: predicated region fallthrough
CT: control target
= control target key end

     0   :  { %s449_s0 = inlined_call_operand.vmem [shape: f32[8,4], index: 0, kind: input, shape index: {}]   ;;  %s450_s1 = inlined_call_operand.vmem [shape: f32[8,4], index: 1, kind: input, shape index: {}]   ;;  %s451_s2 = inlined_call_operand.vmem [shape: f32[8,4], index: 2, kind: input, shape index: {}]   ;;  %s452_s3 = inlined_call_operand.vmem [shape: f32[8,4], index: 3, kind: input, shape index: {}]   ;;  %s453_s4 = inlined_call_operand.vmem [shape: s8[8,4], index: 4, kind: input, shape index: {}]   ;;  %s454_s5 = inlined_call_operand.hbm [shape: f32[1,8,128], index: 5, kind: output, shape index: {}]  }
   0x1   :  { %v170_v0 = vld [vmem:[%s453_s4] sm:$0x3] }
   0x2   :  { %v172_v1 = vld [vmem:[%s449_s0] sm:$0xff]  ;;  %vm171_vm0 = vnez %v170_v0 }
   0x3   :  { %v173_v2 = vld [vmem:[%s450_s1] sm:$0xff] }
   0x4   :  { %v174_v3 = vsub.f32 %v172_v1, %v173_v2  ;;  %v176_v4 = vld [vmem:[%s451_s2] sm:$0xff] }
   0x5   :  { %v177_v5 = vld [vmem:[%s452_s3] sm:$0xff] }
   0x6   :  { %10 = vsyncpa [#allocation3], 0  ;;  %v398_v6 = vmov 0   ;;  %v178_v8 = vsub.f32 %v176_v4, %v177_v5  ;;  %v175_v9 = vmul.f32 %v174_v3, %v174_v3  ;;  %vm184_vm1 = vcmask 31744   ;;  %s400_s3 = smov [#allocation2]  }
   0x7   :  { %v180_v7 = vsel %vm171_vm0, 16843009, %v398_v6  ;;  %v399_v13 = vmov 0.0   ;;  %v218_v40 = vlaneseq  ;;  %s327_s4 = sshll.u32 %s400_s3, 4  ;;  %s328_s4 = int_to_ptr.vmem [resolvable:$true] %s327_s4 }
   0x8   :  { %v181_v10 = vunpack.c.0.s8 %v180_v7  ;;  %v179_v11 = vmul.f32 %v178_v8, %v178_v8  ;;  %s376_s28 = scalar_lea.vmem %s328_s4, 128  ;;  %p381_p1 = scmp.lt.s32.totalorder %s328_s4, %s328_s4 }
   0x9   :  { %v219_v41 = vshrl.u32 %v218_v40, 7  ;;  %v221_v42 = vand.u32 127, %v218_v40  ;;  %p377_p0 = scmp.ne.s32.totalorder %s328_s4, %s376_s28  ;;  %p382_p2 = scmp.lt.s32.totalorder %s376_s28, %s376_s28 }
   0xa   :  { %vm182_vm2 = vcmp.ne.s32.totalorder %v181_v10, 0 }
   0xb   :  { %v183_v12 = vsel %vm182_vm2, %v175_v9, 0.0  ;;  %v365_v14 = vsel %vm182_vm2, 1.0, %v399_v13  ;;  %v195_v15 = vsel %vm182_vm2, %v179_v11, 0.0  ;;  %vm222_vm3 = vcmp.eq.s32.totalorder %v219_v41, 0  ;;  %p383_p3 = por %p382_p2, %p381_p1 }
   0xc   :  { %v185_v16 = vsel %vm184_vm1, %v183_v12, 0.0  ;;  %v208_v17 = vsel %vm184_vm1, %v365_v14, 0.0  ;;  %v196_v18 = vsel %vm184_vm1, %v195_v15, 0.0  ;;  %vm224_vm4 = vcmp.eq.s32.totalorder %v221_v42, 0 }
   0xd   :  { %186 = vadd.xlane.f32.xlu0 %v185_v16  ;;  %209 = vadd.xlane.f32.xlu1 %v208_v17  ;;  %vm228_vm5 = vcmp.eq.s32.totalorder %v221_v42, 1  ;;  %vm225_vm6 = vmand %vm222_vm3, %vm224_vm4  ;;  %vm233_vm7 = vcmp.eq.s32.totalorder %v221_v42, 2  ;;  %p384_p4 = pnand %p383_p3, %p377_p0 }
   0xe   :  { %vm229_vm8 = vmand %vm222_vm3, %vm228_vm5 }
   0xf   :  { %vm234_vm9 = vmand %vm222_vm3, %vm233_vm7 }
  0x11   :  { %197 = vadd.xlane.f32.xlu0 %v196_v18 }
  0x96   :  { %v187_v19 = vpop.xlane.xlu0 %186  ;;  %v210_v20 = vpop.xlane.xlu1 %209 }
  0x97   :  { %v188_v21 = vrot.slane %v187_v19, 4  ;;  %v211_v22 = vrot.slane %v210_v20, 4 }
  0x99   :  { %v189_v23 = vadd.f32 %v188_v21, %v187_v19  ;;  %v212_v24 = vadd.f32 %v211_v22, %v210_v20 }
  0x9a   :  { %v198_v25 = vpop.xlane.xlu0 %197 }
  0x9b   :  { %v190_v26 = vrot.slane %v189_v23, 2  ;;  %v213_v27 = vrot.slane %v212_v24, 2  ;;  %v199_v28 = vrot.slane %v198_v25, 4 }
  0x9d   :  { %v200_v29 = vadd.f32 %v199_v28, %v198_v25  ;;  %v191_v30 = vadd.f32 %v190_v26, %v189_v23  ;;  %v214_v31 = vadd.f32 %v213_v27, %v212_v24 }
  0x9f   :  { %v201_v32 = vrot.slane %v200_v29, 2  ;;  %v192_v33 = vrot.slane %v191_v30, 1  ;;  %v215_v36 = vrot.slane %v214_v31, 1 }
  0xa1   :  { %v202_v34 = vadd.f32 %v201_v32, %v200_v29  ;;  %v193_v35 = vadd.f32 %v192_v33, %v191_v30  ;;  %v216_v39 = vadd.f32 %v215_v36, %v214_v31 }
  0xa3   :  { %367 = vpush %v193_v35  ;;  %v203_v37 = vrot.slane %v202_v34, 1 }
  0xa5   :  { %v204_v38 = vadd.f32 %v203_v37, %v202_v34 }
  0xa7   :  { %369 = vpush %v204_v38 }
  0xa8   :  { %371 = vpush %v216_v39 }
  0xd4   :  { %s368_s0 = spop %367 }
  0xd5   :  { %v226_v43 = vstv %s368_s0 }
  0xd6   :  { %v227_v45 = vsel %vm225_vm6, %v226_v43, 0.0 }
  0xd8   :  { %s370_s1 = spop %369 }
  0xd9   :  { %v230_v44 = vstv %s370_s1  ;;  %s372_s2 = spop %371 }
  0xda   :  { %v231_v46 = vsel %vm229_vm8, %v230_v44, 0.0  ;;  %v235_v47 = vstv %s372_s2 }
  0xdb   :  { %v232_v48 = vadd.f32 %v231_v46, %v227_v45  ;;  %v236_v49 = vsel %vm234_vm9, %v235_v47, 0.0 }
  0xdd   :  { %v237_v50 = vadd.f32 %v236_v49, %v232_v48 }
  0xdf   :  { %239 = vst [vmem:[#allocation2] sm:$0xff] %v237_v50 }
  0xe0   :  { %387 = shalt.err (!%p384_p4)
}
  0xe1   :  { %330 = dma.vmem_to_hbm [thread:$0]  %s328_s4, 128, %s454_s5, [#allocation3]  }
  0xe2   :  { %396 = dma.done.wait [#allocation3], 128  }
  0xe3   :  { %397 = vsyncadd [#allocation3], 4294967168 }
  0xe4   :  { %334 = vsyncpa [#allocation3], 1 }

</bundles_post_ra>
